<compile_context>
chip_gen: v5e
topology: v5e:2x2
jax: 0.10.0
libtpu: 0.0.40
codegen_flags: <defaults>
</compile_context>

<pallas_src>
import functools

import numpy as np
import jax
import jax.numpy as jnp
from jax.experimental import pallas as pl
from jax.experimental.pallas import tpu as pltpu


def _round_up(v, m):
    return ((v + m - 1) // m) * m


# ----------------------------- fused Pallas kernel ---------------------------

def _build_kernel(*, K, n_pre, n_post, L_final, slope):
    """Kernel body for ONE batch element (the grid iterates over the batch).

    Layout: every activation is a 2-D value (C, W) with the length axis on
    lanes; W is a multiple of 128 and shrinks by exactly 128 per conv layer.
    Columns beyond a layer's valid length hold garbage that is never read.
    Each conv layer is K whole-width tap matmuls (bf16 in, f32 accumulate).
    """
    f32, bf16 = jnp.float32, jnp.bfloat16

    def lrelu(v):
        return jnp.where(v >= 0, v, slope * v)

    def conv(act, w_ref):
        # act: (Cin, W) bf16 value; w_ref: (K, Cout, Cin) bf16 -> (Cout, W-128) f32
        w_out = act.shape[1] - 128
        acc = None
        for k in range(K):
            part = jnp.dot(w_ref[k], act[:, k:k + w_out],
                           preferred_element_type=f32)
            acc = part if acc is None else acc + part
        return acc

    def kernel(*refs):
        i = 0
        xs_ref = refs[i]; i += 1           # (1, n_in, W0) zero-stuffed input, bf16
        sc_ref = refs[i]; i += 1           # (1, n_short, W_sc) cropped shortcut, bf16
        up_w_ref, up_b_ref = refs[i], refs[i + 1]; i += 2
        pre_refs = refs[i:i + 2 * n_pre]; i += 2 * n_pre
        post_refs = refs[i:i + 3 * n_post]; i += 3 * n_post
        o_ref = refs[i]

        # ---- ConvTranspose1d(stride, padding=K-1) as a valid conv over the
        #      zero-stuffed input, + bias + LeakyReLU ----
        act = lrelu(conv(xs_ref[0], up_w_ref) + up_b_ref[...])

        # ---- pre-shortcut Conv1d stack (+ bias + LeakyReLU) ----
        for li in range(n_pre):
            w_ref, b_ref = pre_refs[2 * li], pre_refs[2 * li + 1]
            act = lrelu(conv(act.astype(bf16), w_ref) + b_ref[...])
        pre_bf = act.astype(bf16)          # (n_out, W_pre), valid cols [0, L_pre)

        # ---- centre crop + channel concat + post-shortcut Conv1d stack ----
        # The channel concat is folded into split weights (wa: combined/shortcut
        # stream, wb: upsampled stream) -> two tap-matmul accumulations, no concat.
        comb_bf = sc_ref[0]                # (n_short, W_pre) bf16 (already cropped)
        comb = None
        off = 0
        for li in range(n_post):
            wa_ref = post_refs[3 * li]
            wb_ref = post_refs[3 * li + 1]
            b_ref = post_refs[3 * li + 2]
            w_in = comb_bf.shape[1]
            up_in = pre_bf[:, off:off + w_in]      # centre_crop(upsampled, combined)
            comb = lrelu(conv(comb_bf, wa_ref) + conv(up_in, wb_ref) + b_ref[...])
            comb_bf = comb.astype(bf16)
            off += (K - 1) // 2
        o_ref[0, :, :] = comb[:, :L_final].astype(o_ref.dtype)

    return kernel


# ------------------------- one-time weight preparation -----------------------

def prepare_params(raw):
    """Hoisted out of the jitted forward: flip/transpose the ConvTranspose1d
    weight into its equivalent valid-conv form, reshape every conv weight to
    tap-major (K, Cout, Cin), split the post-conv weights into the two concat
    streams, and cast all matmul weights to bf16 (biases stay f32)."""
    up_w = raw["up_w"]                      # (Cin, Cout, K) torch ConvTranspose1d layout
    # Equivalent valid-conv weight of the zero-stuffed formulation:
    #   w_eq[o, c, k] = up_w[c, o, K-1-k]
    w_eq = jnp.flip(jnp.transpose(up_w, (1, 0, 2)), axis=2)

    def tapmajor(w):                        # (Cout, Cin, K) -> (K, Cout, Cin) bf16
        return jnp.transpose(w, (2, 0, 1)).astype(jnp.bfloat16)

    n_out = raw["pre"][-1][0].shape[0]
    post = []
    for w, b in raw["post"]:
        cin = w.shape[1]
        ca = cin - n_out                    # channels of the "combined" stream
        assert ca >= 1, "post conv channel split inconsistent"
        post.append((tapmajor(w[:, :ca, :]),          # combined / shortcut stream
                     tapmajor(w[:, ca:, :]),          # upsampled stream
                     b.reshape(-1, 1).astype(jnp.float32)))

    return dict(
        up_w=tapmajor(w_eq),
        up_b=raw["up_b"].reshape(-1, 1).astype(jnp.float32),
        pre=[(tapmajor(w), b.reshape(-1, 1).astype(jnp.float32))
             for w, b in raw["pre"]],
        post=post,
    )


# ----------------------------- fused forward pass ----------------------------

def upsampling_block_forward(prep, x, shortcut, *, stride, kernel_size, slope=0.01):
    """UpsamplingBlock forward: one pallas_call, grid over the batch axis."""
    B, n_in, L_in = x.shape
    Bs, n_short, L_short = shortcut.shape
    assert Bs == B
    K, s = kernel_size, stride
    assert s >= 1 and 1 <= K <= 129
    n_pre, n_post = len(prep["pre"]), len(prep["post"])
    assert n_pre >= 1 and n_post >= 1
    n_out = prep["pre"][-1][0].shape[1]     # tap-major (K, Cout, Cin)

    # --- static length bookkeeping (pure python ints) ---
    L_stuff = L_in * s                              # zero-stuffed input length
    L_up = (L_in - 1) * s - 2 * (K - 1) + K         # ConvTranspose1d(padding=K-1)
    L_pre = L_up - n_pre * (K - 1)
    L_final = L_pre - n_post * (K - 1)
    assert L_up >= 1 and L_pre >= 1 and L_final >= 1
    diff = L_short - L_pre
    assert diff >= 0 and diff % 2 == 0, "centre_crop needs an even, non-negative diff"
    crop_s = diff // 2

    n_layers = 1 + n_pre + n_post
    W0 = _round_up(L_stuff, 128) + 128 * n_layers   # width shrinks by 128 per layer
    W_sc = W0 - 128 * (1 + n_pre)                   # width at the post-conv input

    # --- wrapper-side layout plumbing (XLA, inputs only) ---
    # zero-stuff x by the stride (positions i*s hold x[i], the rest 0), pad, bf16
    xs = jnp.pad(x[..., None], ((0, 0), (0, 0), (0, 0), (0, s - 1)))
    xs = xs.reshape(B, n_in, L_stuff)
    xs = jnp.pad(xs, ((0, 0), (0, 0), (0, W0 - L_stuff))).astype(jnp.bfloat16)
    # centre-crop the shortcut to L_pre, pad, bf16
    sc = jax.lax.slice_in_dim(shortcut, crop_s, crop_s + L_pre, axis=2)
    sc = jnp.pad(sc, ((0, 0), (0, 0), (0, W_sc - L_pre))).astype(jnp.bfloat16)

    kernel = _build_kernel(K=K, n_pre=n_pre, n_post=n_post,
                           L_final=L_final, slope=slope)

    def const_spec(a):                      # whole array as one resident block
        idx = (0,) * a.ndim
        return pl.BlockSpec(a.shape, lambda b, _i=idx: _i)

    inputs = [xs, sc, prep["up_w"], prep["up_b"]]
    in_specs = [pl.BlockSpec((1, n_in, W0), lambda b: (b, 0, 0)),
                pl.BlockSpec((1, n_short, W_sc), lambda b: (b, 0, 0)),
                const_spec(prep["up_w"]), const_spec(prep["up_b"])]
    for w, bias in prep["pre"]:
        inputs += [w, bias]
        in_specs += [const_spec(w), const_spec(bias)]
    for wa, wb, bias in prep["post"]:
        inputs += [wa, wb, bias]
        in_specs += [const_spec(wa), const_spec(wb), const_spec(bias)]

    return pl.pallas_call(
        kernel,
        grid=(B,),
        out_shape=jax.ShapeDtypeStruct((B, n_out, L_final), x.dtype),
        in_specs=in_specs,
        out_specs=pl.BlockSpec((1, n_out, L_final), lambda b: (b, 0, 0)),
        compiler_params=pltpu.CompilerParams(
            dimension_semantics=("parallel",),
            vmem_limit_bytes=48 * 1024 * 1024),
    )(*inputs)


# --------------------------- parameter init (torch layouts) ------------------

def init_params(key, n_inputs, n_shortcut, n_outputs, K, depth):
    def conv_p(k, cin, cout):
        kw, kb = jax.random.split(k)
        w = jax.random.normal(kw, (cout, cin, K), jnp.float32) * 0.1
        b = jax.random.normal(kb, (cout,), jnp.float32) * 0.1
        return w, b

    k_up, k_pre, k_post = jax.random.split(key, 3)
    kuw, kub = jax.random.split(k_up)
    # ConvTranspose1d weight layout: (Cin, Cout, K)
    up_w = jax.random.normal(kuw, (n_inputs, n_inputs, K), jnp.float32) * 0.1
    up_b = jax.random.normal(kub, (n_inputs,), jnp.float32) * 0.1

    pre, cin = [], n_inputs
    for k in jax.random.split(k_pre, depth):
        pre.append(conv_p(k, cin, n_outputs))
        cin = n_outputs

    post, cin = [], n_outputs + n_shortcut
    for k in jax.random.split(k_post, depth):
        post.append(conv_p(k, cin, n_outputs))
        cin = n_outputs

    return dict(up_w=up_w, up_b=up_b, pre=pre, post=post)


# -------------------- independent numpy (fp64) reference ---------------------

def _np_lrelu(x, slope=0.01):
    return np.where(x >= 0, x, slope * x)


def _np_conv1d(x, w, b):
    B, Cin, L = x.shape
    Cout, _, K = w.shape
    Lo = L - K + 1
    out = np.zeros((B, Cout, Lo), np.float64)
    for k in range(K):
        out += np.einsum("oc,bcl->bol", w[:, :, k], x[:, :, k:k + Lo])
    return out + b[None, :, None]


def _np_conv_transpose1d(x, w, b, stride, padding):
    B, Cin, L = x.shape
    _, Cout, K = w.shape
    Lo = (L - 1) * stride - 2 * padding + K
    out = np.zeros((B, Cout, Lo), np.float64)
    for i in range(L):
        for j in range(K):
            t = i * stride + j - padding
            if 0 <= t < Lo:
                out[:, :, t] += np.einsum("bc,co->bo", x[:, :, i], w[:, :, j])
    return out + b[None, :, None]


def _np_centre_crop(x, target_len):
    crop = (x.shape[-1] - target_len) // 2
    return x if crop == 0 else x[:, :, crop:-crop]


def ref_forward(params, x, shortcut, stride, K, slope=0.01):
    p = jax.tree_util.tree_map(lambda a: np.asarray(a, np.float64), params)
    x = np.asarray(x, np.float64)
    shortcut = np.asarray(shortcut, np.float64)
    up = _np_lrelu(_np_conv_transpose1d(x, p["up_w"], p["up_b"], stride, K - 1), slope)
    for w, b in p["pre"]:
        up = _np_lrelu(_np_conv1d(up, w, b), slope)
    combined = _np_centre_crop(shortcut, up.shape[-1])
    for w, b in p["post"]:
        cat = np.concatenate([combined, _np_centre_crop(up, combined.shape[-1])], axis=1)
        combined = _np_lrelu(_np_conv1d(cat, w, b), slope)
    return combined


# ------------------------------------ main -----------------------------------

if __name__ == "__main__":
    # UpsamplingBlock(n_inputs=4, n_shortcut=4, n_outputs=8, kernel_size=5,
    #                 stride=2, depth=1, conv_type="normal", res="learned")
    n_inputs, n_shortcut, n_outputs = 4, 4, 8
    kernel_size, stride, depth = 5, 2, 1
    B, L_in, L_short = 2, 16, 27

    key = jax.random.PRNGKey(0)
    k_p, k_x, k_s = jax.random.split(key, 3)
    raw_params = init_params(k_p, n_inputs, n_shortcut, n_outputs, kernel_size, depth)
    prep = prepare_params(raw_params)                 # one-time weight prep (bf16)
    x = jax.random.normal(k_x, (B, n_inputs, L_in), jnp.float32)
    shortcut = jax.random.normal(k_s, (B, n_shortcut, L_short), jnp.float32)

    fwd = jax.jit(functools.partial(upsampling_block_forward,
                                    stride=stride, kernel_size=kernel_size))
    out = jax.block_until_ready(fwd(prep, x, shortcut))

    # Expected: upconv 16->27, pre 27->23, crop shortcut 27->23, post 23->19.
    assert out.shape == (B, n_outputs, 19), out.shape

    ref = ref_forward(raw_params, x, shortcut, stride, kernel_size)
    # bf16 MXU inputs (f32 accumulation) vs fp64 reference -> loosened tolerances.
    if not np.allclose(np.asarray(out), ref, rtol=5e-2, atol=5e-2):
        err = float(np.max(np.abs(np.asarray(out) - ref)))
        raise AssertionError(f"Pallas result does not match reference (max err {err})")

    print("KERNEL_OK")
</pallas_src>

<mosaic_0001>
module attributes {stable_mosaic.version = 11 : i64} {
  func.func @kernel(%arg0: i32, %arg1: memref<1x4x512xbf16, #tpu.memory_space<vmem>>, %arg2: memref<1x4x256xbf16, #tpu.memory_space<vmem>>, %arg3: memref<5x4x4xbf16, #tpu.memory_space<vmem>>, %arg4: memref<4x1xf32, #tpu.memory_space<vmem>>, %arg5: memref<5x8x4xbf16, #tpu.memory_space<vmem>>, %arg6: memref<8x1xf32, #tpu.memory_space<vmem>>, %arg7: memref<5x8x4xbf16, #tpu.memory_space<vmem>>, %arg8: memref<5x8x8xbf16, #tpu.memory_space<vmem>>, %arg9: memref<8x1xf32, #tpu.memory_space<vmem>>, %arg10: memref<1x8x19xf32, #tpu.memory_space<vmem>>) attributes {dimension_semantics = [#tpu.dimension_semantics<parallel>], iteration_bounds = array<i64: 2>, scalar_prefetch = 0 : i64, scratch_operands = 0 : i64, tpu.core_type = #tpu.core_type<tc>, window_params = [{transform_indices = @transform_0, window_bounds = array<i64: 1, 4, 512>}, {transform_indices = @transform_1, window_bounds = array<i64: 1, 4, 256>}, {pipeline_mode = #tpu.pipeline_mode<synchronous>, transform_indices = @transform_2, window_bounds = array<i64: 5, 4, 4>}, {pipeline_mode = #tpu.pipeline_mode<synchronous>, transform_indices = @transform_3, window_bounds = array<i64: 4, 1>}, {pipeline_mode = #tpu.pipeline_mode<synchronous>, transform_indices = @transform_4, window_bounds = array<i64: 5, 8, 4>}, {pipeline_mode = #tpu.pipeline_mode<synchronous>, transform_indices = @transform_5, window_bounds = array<i64: 8, 1>}, {pipeline_mode = #tpu.pipeline_mode<synchronous>, transform_indices = @transform_6, window_bounds = array<i64: 5, 8, 4>}, {pipeline_mode = #tpu.pipeline_mode<synchronous>, transform_indices = @transform_7, window_bounds = array<i64: 5, 8, 8>}, {pipeline_mode = #tpu.pipeline_mode<synchronous>, transform_indices = @transform_8, window_bounds = array<i64: 8, 1>}, {transform_indices = @transform_9, window_bounds = array<i64: 1, 8, 19>}]} {
    %c0 = arith.constant 0 : index
    %c0_0 = arith.constant 0 : index
    %c0_1 = arith.constant 0 : index
    %0 = vector.load %arg1[%c0, %c0_0, %c0_1] : memref<1x4x512xbf16, #tpu.memory_space<vmem>>, vector<1x4x512xbf16>
    %1 = vector.shape_cast %0 : vector<1x4x512xbf16> to vector<4x512xbf16>
    %c0_2 = arith.constant 0 : index
    %c0_3 = arith.constant 0 : index
    %c0_4 = arith.constant 0 : index
    %2 = vector.load %arg3[%c0_2, %c0_3, %c0_4] : memref<5x4x4xbf16, #tpu.memory_space<vmem>>, vector<1x4x4xbf16>
    %3 = vector.shape_cast %2 : vector<1x4x4xbf16> to vector<4x4xbf16>
    %4 = vector.extract_strided_slice %1 {offsets = [0, 0], sizes = [4, 384], strides = [1, 1]} : vector<4x512xbf16> to vector<4x384xbf16>
    %cst = arith.constant dense<0.000000e+00> : vector<4x384xf32>
    %5 = tpu.matmul %3, %4, %cst {dimension_numbers = #tpu.dot_dimension_numbers<[1], [0], [0], [1], [0, 0, 1, 1], [], []>} : vector<4x4xbf16>, vector<4x384xbf16>, vector<4x384xf32> -> vector<4x384xf32>
    %c1 = arith.constant 1 : index
    %c0_5 = arith.constant 0 : index
    %c0_6 = arith.constant 0 : index
    %6 = vector.load %arg3[%c1, %c0_5, %c0_6] : memref<5x4x4xbf16, #tpu.memory_space<vmem>>, vector<1x4x4xbf16>
    %7 = vector.shape_cast %6 : vector<1x4x4xbf16> to vector<4x4xbf16>
    %8 = vector.extract_strided_slice %1 {offsets = [0, 1], sizes = [4, 384], strides = [1, 1]} : vector<4x512xbf16> to vector<4x384xbf16>
    %cst_7 = arith.constant dense<0.000000e+00> : vector<4x384xf32>
    %9 = tpu.matmul %7, %8, %cst_7 {dimension_numbers = #tpu.dot_dimension_numbers<[1], [0], [0], [1], [0, 0, 1, 1], [], []>} : vector<4x4xbf16>, vector<4x384xbf16>, vector<4x384xf32> -> vector<4x384xf32>
    %10 = arith.addf %5, %9 : vector<4x384xf32>
    %c2 = arith.constant 2 : index
    %c0_8 = arith.constant 0 : index
    %c0_9 = arith.constant 0 : index
    %11 = vector.load %arg3[%c2, %c0_8, %c0_9] : memref<5x4x4xbf16, #tpu.memory_space<vmem>>, vector<1x4x4xbf16>
    %12 = vector.shape_cast %11 : vector<1x4x4xbf16> to vector<4x4xbf16>
    %13 = vector.extract_strided_slice %1 {offsets = [0, 2], sizes = [4, 384], strides = [1, 1]} : vector<4x512xbf16> to vector<4x384xbf16>
    %cst_10 = arith.constant dense<0.000000e+00> : vector<4x384xf32>
    %14 = tpu.matmul %12, %13, %cst_10 {dimension_numbers = #tpu.dot_dimension_numbers<[1], [0], [0], [1], [0, 0, 1, 1], [], []>} : vector<4x4xbf16>, vector<4x384xbf16>, vector<4x384xf32> -> vector<4x384xf32>
    %15 = arith.addf %10, %14 : vector<4x384xf32>
    %c3 = arith.constant 3 : index
    %c0_11 = arith.constant 0 : index
    %c0_12 = arith.constant 0 : index
    %16 = vector.load %arg3[%c3, %c0_11, %c0_12] : memref<5x4x4xbf16, #tpu.memory_space<vmem>>, vector<1x4x4xbf16>
    %17 = vector.shape_cast %16 : vector<1x4x4xbf16> to vector<4x4xbf16>
    %18 = vector.extract_strided_slice %1 {offsets = [0, 3], sizes = [4, 384], strides = [1, 1]} : vector<4x512xbf16> to vector<4x384xbf16>
    %cst_13 = arith.constant dense<0.000000e+00> : vector<4x384xf32>
    %19 = tpu.matmul %17, %18, %cst_13 {dimension_numbers = #tpu.dot_dimension_numbers<[1], [0], [0], [1], [0, 0, 1, 1], [], []>} : vector<4x4xbf16>, vector<4x384xbf16>, vector<4x384xf32> -> vector<4x384xf32>
    %20 = arith.addf %15, %19 : vector<4x384xf32>
    %c4 = arith.constant 4 : index
    %c0_14 = arith.constant 0 : index
    %c0_15 = arith.constant 0 : index
    %21 = vector.load %arg3[%c4, %c0_14, %c0_15] : memref<5x4x4xbf16, #tpu.memory_space<vmem>>, vector<1x4x4xbf16>
    %22 = vector.shape_cast %21 : vector<1x4x4xbf16> to vector<4x4xbf16>
    %23 = vector.extract_strided_slice %1 {offsets = [0, 4], sizes = [4, 384], strides = [1, 1]} : vector<4x512xbf16> to vector<4x384xbf16>
    %cst_16 = arith.constant dense<0.000000e+00> : vector<4x384xf32>
    %24 = tpu.matmul %22, %23, %cst_16 {dimension_numbers = #tpu.dot_dimension_numbers<[1], [0], [0], [1], [0, 0, 1, 1], [], []>} : vector<4x4xbf16>, vector<4x384xbf16>, vector<4x384xf32> -> vector<4x384xf32>
    %25 = arith.addf %20, %24 : vector<4x384xf32>
    %c0_17 = arith.constant 0 : index
    %c0_18 = arith.constant 0 : index
    %26 = vector.load %arg4[%c0_17, %c0_18] : memref<4x1xf32, #tpu.memory_space<vmem>>, vector<4x1xf32>
    %27 = vector.broadcast %26 : vector<4x1xf32> to vector<4x384xf32>
    %28 = arith.addf %25, %27 : vector<4x384xf32>
    %cst_19 = arith.constant 0.000000e+00 : f32
    %29 = vector.broadcast %cst_19 : f32 to vector<4x384xf32>
    %30 = arith.cmpf oge, %28, %29 : vector<4x384xf32>
    %cst_20 = arith.constant 0.00999999977 : f32
    %31 = vector.broadcast %cst_20 : f32 to vector<4x384xf32>
    %32 = arith.mulf %31, %28 : vector<4x384xf32>
    %33 = arith.select %30, %28, %32 : vector<4x384xi1>, vector<4x384xf32>
    %34 = arith.truncf %33 : vector<4x384xf32> to vector<4x384xbf16>
    %c0_21 = arith.constant 0 : index
    %c0_22 = arith.constant 0 : index
    %c0_23 = arith.constant 0 : index
    %35 = vector.load %arg5[%c0_21, %c0_22, %c0_23] : memref<5x8x4xbf16, #tpu.memory_space<vmem>>, vector<1x8x4xbf16>
    %36 = vector.shape_cast %35 : vector<1x8x4xbf16> to vector<8x4xbf16>
    %37 = vector.extract_strided_slice %34 {offsets = [0, 0], sizes = [4, 256], strides = [1, 1]} : vector<4x384xbf16> to vector<4x256xbf16>
    %cst_24 = arith.constant dense<0.000000e+00> : vector<8x256xf32>
    %38 = tpu.matmul %36, %37, %cst_24 {dimension_numbers = #tpu.dot_dimension_numbers<[1], [0], [0], [1], [0, 0, 1, 1], [], []>} : vector<8x4xbf16>, vector<4x256xbf16>, vector<8x256xf32> -> vector<8x256xf32>
    %c1_25 = arith.constant 1 : index
    %c0_26 = arith.constant 0 : index
    %c0_27 = arith.constant 0 : index
    %39 = vector.load %arg5[%c1_25, %c0_26, %c0_27] : memref<5x8x4xbf16, #tpu.memory_space<vmem>>, vector<1x8x4xbf16>
    %40 = vector.shape_cast %39 : vector<1x8x4xbf16> to vector<8x4xbf16>
    %41 = vector.extract_strided_slice %34 {offsets = [0, 1], sizes = [4, 256], strides = [1, 1]} : vector<4x384xbf16> to vector<4x256xbf16>
    %cst_28 = arith.constant dense<0.000000e+00> : vector<8x256xf32>
    %42 = tpu.matmul %40, %41, %cst_28 {dimension_numbers = #tpu.dot_dimension_numbers<[1], [0], [0], [1], [0, 0, 1, 1], [], []>} : vector<8x4xbf16>, vector<4x256xbf16>, vector<8x256xf32> -> vector<8x256xf32>
    %43 = arith.addf %38, %42 : vector<8x256xf32>
    %c2_29 = arith.constant 2 : index
    %c0_30 = arith.constant 0 : index
    %c0_31 = arith.constant 0 : index
    %44 = vector.load %arg5[%c2_29, %c0_30, %c0_31] : memref<5x8x4xbf16, #tpu.memory_space<vmem>>, vector<1x8x4xbf16>
    %45 = vector.shape_cast %44 : vector<1x8x4xbf16> to vector<8x4xbf16>
    %46 = vector.extract_strided_slice %34 {offsets = [0, 2], sizes = [4, 256], strides = [1, 1]} : vector<4x384xbf16> to vector<4x256xbf16>
    %cst_32 = arith.constant dense<0.000000e+00> : vector<8x256xf32>
    %47 = tpu.matmul %45, %46, %cst_32 {dimension_numbers = #tpu.dot_dimension_numbers<[1], [0], [0], [1], [0, 0, 1, 1], [], []>} : vector<8x4xbf16>, vector<4x256xbf16>, vector<8x256xf32> -> vector<8x256xf32>
    %48 = arith.addf %43, %47 : vector<8x256xf32>
    %c3_33 = arith.constant 3 : index
    %c0_34 = arith.constant 0 : index
    %c0_35 = arith.constant 0 : index
    %49 = vector.load %arg5[%c3_33, %c0_34, %c0_35] : memref<5x8x4xbf16, #tpu.memory_space<vmem>>, vector<1x8x4xbf16>
    %50 = vector.shape_cast %49 : vector<1x8x4xbf16> to vector<8x4xbf16>
    %51 = vector.extract_strided_slice %34 {offsets = [0, 3], sizes = [4, 256], strides = [1, 1]} : vector<4x384xbf16> to vector<4x256xbf16>
    %cst_36 = arith.constant dense<0.000000e+00> : vector<8x256xf32>
    %52 = tpu.matmul %50, %51, %cst_36 {dimension_numbers = #tpu.dot_dimension_numbers<[1], [0], [0], [1], [0, 0, 1, 1], [], []>} : vector<8x4xbf16>, vector<4x256xbf16>, vector<8x256xf32> -> vector<8x256xf32>
    %53 = arith.addf %48, %52 : vector<8x256xf32>
    %c4_37 = arith.constant 4 : index
    %c0_38 = arith.constant 0 : index
    %c0_39 = arith.constant 0 : index
    %54 = vector.load %arg5[%c4_37, %c0_38, %c0_39] : memref<5x8x4xbf16, #tpu.memory_space<vmem>>, vector<1x8x4xbf16>
    %55 = vector.shape_cast %54 : vector<1x8x4xbf16> to vector<8x4xbf16>
    %56 = vector.extract_strided_slice %34 {offsets = [0, 4], sizes = [4, 256], strides = [1, 1]} : vector<4x384xbf16> to vector<4x256xbf16>
    %cst_40 = arith.constant dense<0.000000e+00> : vector<8x256xf32>
    %57 = tpu.matmul %55, %56, %cst_40 {dimension_numbers = #tpu.dot_dimension_numbers<[1], [0], [0], [1], [0, 0, 1, 1], [], []>} : vector<8x4xbf16>, vector<4x256xbf16>, vector<8x256xf32> -> vector<8x256xf32>
    %58 = arith.addf %53, %57 : vector<8x256xf32>
    %c0_41 = arith.constant 0 : index
    %c0_42 = arith.constant 0 : index
    %59 = vector.load %arg6[%c0_41, %c0_42] : memref<8x1xf32, #tpu.memory_space<vmem>>, vector<8x1xf32>
    %60 = vector.broadcast %59 : vector<8x1xf32> to vector<8x256xf32>
    %61 = arith.addf %58, %60 : vector<8x256xf32>
    %cst_43 = arith.constant 0.000000e+00 : f32
    %62 = vector.broadcast %cst_43 : f32 to vector<8x256xf32>
    %63 = arith.cmpf oge, %61, %62 : vector<8x256xf32>
    %cst_44 = arith.constant 0.00999999977 : f32
    %64 = vector.broadcast %cst_44 : f32 to vector<8x256xf32>
    %65 = arith.mulf %64, %61 : vector<8x256xf32>
    %66 = arith.select %63, %61, %65 : vector<8x256xi1>, vector<8x256xf32>
    %67 = arith.truncf %66 : vector<8x256xf32> to vector<8x256xbf16>
    %c0_45 = arith.constant 0 : index
    %c0_46 = arith.constant 0 : index
    %c0_47 = arith.constant 0 : index
    %68 = vector.load %arg2[%c0_45, %c0_46, %c0_47] : memref<1x4x256xbf16, #tpu.memory_space<vmem>>, vector<1x4x256xbf16>
    %69 = vector.shape_cast %68 : vector<1x4x256xbf16> to vector<4x256xbf16>
    %c0_48 = arith.constant 0 : index
    %c0_49 = arith.constant 0 : index
    %c0_50 = arith.constant 0 : index
    %70 = vector.load %arg7[%c0_48, %c0_49, %c0_50] : memref<5x8x4xbf16, #tpu.memory_space<vmem>>, vector<1x8x4xbf16>
    %71 = vector.shape_cast %70 : vector<1x8x4xbf16> to vector<8x4xbf16>
    %72 = vector.extract_strided_slice %69 {offsets = [0, 0], sizes = [4, 128], strides = [1, 1]} : vector<4x256xbf16> to vector<4x128xbf16>
    %cst_51 = arith.constant dense<0.000000e+00> : vector<8x128xf32>
    %73 = tpu.matmul %71, %72, %cst_51 {dimension_numbers = #tpu.dot_dimension_numbers<[1], [0], [0], [1], [0, 0, 1, 1], [], []>} : vector<8x4xbf16>, vector<4x128xbf16>, vector<8x128xf32> -> vector<8x128xf32>
    %c1_52 = arith.constant 1 : index
    %c0_53 = arith.constant 0 : index
    %c0_54 = arith.constant 0 : index
    %74 = vector.load %arg7[%c1_52, %c0_53, %c0_54] : memref<5x8x4xbf16, #tpu.memory_space<vmem>>, vector<1x8x4xbf16>
    %75 = vector.shape_cast %74 : vector<1x8x4xbf16> to vector<8x4xbf16>
    %76 = vector.extract_strided_slice %69 {offsets = [0, 1], sizes = [4, 128], strides = [1, 1]} : vector<4x256xbf16> to vector<4x128xbf16>
    %cst_55 = arith.constant dense<0.000000e+00> : vector<8x128xf32>
    %77 = tpu.matmul %75, %76, %cst_55 {dimension_numbers = #tpu.dot_dimension_numbers<[1], [0], [0], [1], [0, 0, 1, 1], [], []>} : vector<8x4xbf16>, vector<4x128xbf16>, vector<8x128xf32> -> vector<8x128xf32>
    %78 = arith.addf %73, %77 : vector<8x128xf32>
    %c2_56 = arith.constant 2 : index
    %c0_57 = arith.constant 0 : index
    %c0_58 = arith.constant 0 : index
    %79 = vector.load %arg7[%c2_56, %c0_57, %c0_58] : memref<5x8x4xbf16, #tpu.memory_space<vmem>>, vector<1x8x4xbf16>
    %80 = vector.shape_cast %79 : vector<1x8x4xbf16> to vector<8x4xbf16>
    %81 = vector.extract_strided_slice %69 {offsets = [0, 2], sizes = [4, 128], strides = [1, 1]} : vector<4x256xbf16> to vector<4x128xbf16>
    %cst_59 = arith.constant dense<0.000000e+00> : vector<8x128xf32>
    %82 = tpu.matmul %80, %81, %cst_59 {dimension_numbers = #tpu.dot_dimension_numbers<[1], [0], [0], [1], [0, 0, 1, 1], [], []>} : vector<8x4xbf16>, vector<4x128xbf16>, vector<8x128xf32> -> vector<8x128xf32>
    %83 = arith.addf %78, %82 : vector<8x128xf32>
    %c3_60 = arith.constant 3 : index
    %c0_61 = arith.constant 0 : index
    %c0_62 = arith.constant 0 : index
    %84 = vector.load %arg7[%c3_60, %c0_61, %c0_62] : memref<5x8x4xbf16, #tpu.memory_space<vmem>>, vector<1x8x4xbf16>
    %85 = vector.shape_cast %84 : vector<1x8x4xbf16> to vector<8x4xbf16>
    %86 = vector.extract_strided_slice %69 {offsets = [0, 3], sizes = [4, 128], strides = [1, 1]} : vector<4x256xbf16> to vector<4x128xbf16>
    %cst_63 = arith.constant dense<0.000000e+00> : vector<8x128xf32>
    %87 = tpu.matmul %85, %86, %cst_63 {dimension_numbers = #tpu.dot_dimension_numbers<[1], [0], [0], [1], [0, 0, 1, 1], [], []>} : vector<8x4xbf16>, vector<4x128xbf16>, vector<8x128xf32> -> vector<8x128xf32>
    %88 = arith.addf %83, %87 : vector<8x128xf32>
    %c4_64 = arith.constant 4 : index
    %c0_65 = arith.constant 0 : index
    %c0_66 = arith.constant 0 : index
    %89 = vector.load %arg7[%c4_64, %c0_65, %c0_66] : memref<5x8x4xbf16, #tpu.memory_space<vmem>>, vector<1x8x4xbf16>
    %90 = vector.shape_cast %89 : vector<1x8x4xbf16> to vector<8x4xbf16>
    %91 = vector.extract_strided_slice %69 {offsets = [0, 4], sizes = [4, 128], strides = [1, 1]} : vector<4x256xbf16> to vector<4x128xbf16>
    %cst_67 = arith.constant dense<0.000000e+00> : vector<8x128xf32>
    %92 = tpu.matmul %90, %91, %cst_67 {dimension_numbers = #tpu.dot_dimension_numbers<[1], [0], [0], [1], [0, 0, 1, 1], [], []>} : vector<8x4xbf16>, vector<4x128xbf16>, vector<8x128xf32> -> vector<8x128xf32>
    %93 = arith.addf %88, %92 : vector<8x128xf32>
    %c0_68 = arith.constant 0 : index
    %c0_69 = arith.constant 0 : index
    %c0_70 = arith.constant 0 : index
    %94 = vector.load %arg8[%c0_68, %c0_69, %c0_70] : memref<5x8x8xbf16, #tpu.memory_space<vmem>>, vector<1x8x8xbf16>
    %95 = vector.shape_cast %94 : vector<1x8x8xbf16> to vector<8x8xbf16>
    %96 = vector.extract_strided_slice %67 {offsets = [0, 0], sizes = [8, 128], strides = [1, 1]} : vector<8x256xbf16> to vector<8x128xbf16>
    %cst_71 = arith.constant dense<0.000000e+00> : vector<8x128xf32>
    %97 = tpu.matmul %95, %96, %cst_71 {dimension_numbers = #tpu.dot_dimension_numbers<[1], [0], [0], [1], [0, 0, 1, 1], [], []>} : vector<8x8xbf16>, vector<8x128xbf16>, vector<8x128xf32> -> vector<8x128xf32>
    %c1_72 = arith.constant 1 : index
    %c0_73 = arith.constant 0 : index
    %c0_74 = arith.constant 0 : index
    %98 = vector.load %arg8[%c1_72, %c0_73, %c0_74] : memref<5x8x8xbf16, #tpu.memory_space<vmem>>, vector<1x8x8xbf16>
    %99 = vector.shape_cast %98 : vector<1x8x8xbf16> to vector<8x8xbf16>
    %100 = vector.extract_strided_slice %67 {offsets = [0, 1], sizes = [8, 128], strides = [1, 1]} : vector<8x256xbf16> to vector<8x128xbf16>
    %cst_75 = arith.constant dense<0.000000e+00> : vector<8x128xf32>
    %101 = tpu.matmul %99, %100, %cst_75 {dimension_numbers = #tpu.dot_dimension_numbers<[1], [0], [0], [1], [0, 0, 1, 1], [], []>} : vector<8x8xbf16>, vector<8x128xbf16>, vector<8x128xf32> -> vector<8x128xf32>
    %102 = arith.addf %97, %101 : vector<8x128xf32>
    %c2_76 = arith.constant 2 : index
    %c0_77 = arith.constant 0 : index
    %c0_78 = arith.constant 0 : index
    %103 = vector.load %arg8[%c2_76, %c0_77, %c0_78] : memref<5x8x8xbf16, #tpu.memory_space<vmem>>, vector<1x8x8xbf16>
    %104 = vector.shape_cast %103 : vector<1x8x8xbf16> to vector<8x8xbf16>
    %105 = vector.extract_strided_slice %67 {offsets = [0, 2], sizes = [8, 128], strides = [1, 1]} : vector<8x256xbf16> to vector<8x128xbf16>
    %cst_79 = arith.constant dense<0.000000e+00> : vector<8x128xf32>
    %106 = tpu.matmul %104, %105, %cst_79 {dimension_numbers = #tpu.dot_dimension_numbers<[1], [0], [0], [1], [0, 0, 1, 1], [], []>} : vector<8x8xbf16>, vector<8x128xbf16>, vector<8x128xf32> -> vector<8x128xf32>
    %107 = arith.addf %102, %106 : vector<8x128xf32>
    %c3_80 = arith.constant 3 : index
    %c0_81 = arith.constant 0 : index
    %c0_82 = arith.constant 0 : index
    %108 = vector.load %arg8[%c3_80, %c0_81, %c0_82] : memref<5x8x8xbf16, #tpu.memory_space<vmem>>, vector<1x8x8xbf16>
    %109 = vector.shape_cast %108 : vector<1x8x8xbf16> to vector<8x8xbf16>
    %110 = vector.extract_strided_slice %67 {offsets = [0, 3], sizes = [8, 128], strides = [1, 1]} : vector<8x256xbf16> to vector<8x128xbf16>
    %cst_83 = arith.constant dense<0.000000e+00> : vector<8x128xf32>
    %111 = tpu.matmul %109, %110, %cst_83 {dimension_numbers = #tpu.dot_dimension_numbers<[1], [0], [0], [1], [0, 0, 1, 1], [], []>} : vector<8x8xbf16>, vector<8x128xbf16>, vector<8x128xf32> -> vector<8x128xf32>
    %112 = arith.addf %107, %111 : vector<8x128xf32>
    %c4_84 = arith.constant 4 : index
    %c0_85 = arith.constant 0 : index
    %c0_86 = arith.constant 0 : index
    %113 = vector.load %arg8[%c4_84, %c0_85, %c0_86] : memref<5x8x8xbf16, #tpu.memory_space<vmem>>, vector<1x8x8xbf16>
    %114 = vector.shape_cast %113 : vector<1x8x8xbf16> to vector<8x8xbf16>
    %115 = vector.extract_strided_slice %67 {offsets = [0, 4], sizes = [8, 128], strides = [1, 1]} : vector<8x256xbf16> to vector<8x128xbf16>
    %cst_87 = arith.constant dense<0.000000e+00> : vector<8x128xf32>
    %116 = tpu.matmul %114, %115, %cst_87 {dimension_numbers = #tpu.dot_dimension_numbers<[1], [0], [0], [1], [0, 0, 1, 1], [], []>} : vector<8x8xbf16>, vector<8x128xbf16>, vector<8x128xf32> -> vector<8x128xf32>
    %117 = arith.addf %112, %116 : vector<8x128xf32>
    %118 = arith.addf %93, %117 : vector<8x128xf32>
    %c0_88 = arith.constant 0 : index
    %c0_89 = arith.constant 0 : index
    %119 = vector.load %arg9[%c0_88, %c0_89] : memref<8x1xf32, #tpu.memory_space<vmem>>, vector<8x1xf32>
    %120 = vector.broadcast %119 : vector<8x1xf32> to vector<8x128xf32>
    %121 = arith.addf %118, %120 : vector<8x128xf32>
    %cst_90 = arith.constant 0.000000e+00 : f32
    %122 = vector.broadcast %cst_90 : f32 to vector<8x128xf32>
    %123 = arith.cmpf oge, %121, %122 : vector<8x128xf32>
    %cst_91 = arith.constant 0.00999999977 : f32
    %124 = vector.broadcast %cst_91 : f32 to vector<8x128xf32>
    %125 = arith.mulf %124, %121 : vector<8x128xf32>
    %126 = arith.select %123, %121, %125 : vector<8x128xi1>, vector<8x128xf32>
    %127 = vector.extract_strided_slice %126 {offsets = [0, 0], sizes = [8, 19], strides = [1, 1]} : vector<8x128xf32> to vector<8x19xf32>
    %c0_92 = arith.constant 0 : index
    %c0_93 = arith.constant 0 : index
    %c0_94 = arith.constant 0 : index
    %128 = vector.load %arg10[%c0_92, %c0_93, %c0_94] : memref<1x8x19xf32, #tpu.memory_space<vmem>>, vector<1x8x19xf32>
    %129 = vector.shape_cast %128 : vector<1x8x19xf32> to vector<8x19xf32>
    %130 = vector.shape_cast %127 : vector<8x19xf32> to vector<1x8x19xf32>
    tpu.vector_store %arg10[%c0_92, %c0_93, %c0_94], %130 {strides = array<i32>} : memref<1x8x19xf32, #tpu.memory_space<vmem>>, vector<1x8x19xf32>,
    return
  }
  func.func @transform_0(%arg0: i32) -> (i32, i32, i32) {
    %c0_i32 = arith.constant 0 : i32
    %c0_i32_0 = arith.constant 0 : i32
    %c0_i32_1 = arith.constant 0 : i32
    return %arg0, %c0_i32, %c0_i32_0 : i32, i32, i32
  }
  func.func @transform_1(%arg0: i32) -> (i32, i32, i32) {
    %c0_i32 = arith.constant 0 : i32
    %c0_i32_0 = arith.constant 0 : i32
    %c0_i32_1 = arith.constant 0 : i32
    return %arg0, %c0_i32, %c0_i32_0 : i32, i32, i32
  }
  func.func @transform_2(%arg0: i32) -> (i32, i32, i32) {
    %c0_i32 = arith.constant 0 : i32
    %c0_i32_0 = arith.constant 0 : i32
    %c0_i32_1 = arith.constant 0 : i32
    %c0_i32_2 = arith.constant 0 : i32
    return %c0_i32, %c0_i32_0, %c0_i32_1 : i32, i32, i32
  }
  func.func @transform_3(%arg0: i32) -> (i32, i32) {
    %c0_i32 = arith.constant 0 : i32
    %c0_i32_0 = arith.constant 0 : i32
    %c0_i32_1 = arith.constant 0 : i32
    return %c0_i32, %c0_i32_0 : i32, i32
  }
  func.func @transform_4(%arg0: i32) -> (i32, i32, i32) {
    %c0_i32 = arith.constant 0 : i32
    %c0_i32_0 = arith.constant 0 : i32
    %c0_i32_1 = arith.constant 0 : i32
    %c0_i32_2 = arith.constant 0 : i32
    return %c0_i32, %c0_i32_0, %c0_i32_1 : i32, i32, i32
  }
  func.func @transform_5(%arg0: i32) -> (i32, i32) {
    %c0_i32 = arith.constant 0 : i32
    %c0_i32_0 = arith.constant 0 : i32
    %c0_i32_1 = arith.constant 0 : i32
    return %c0_i32, %c0_i32_0 : i32, i32
  }
  func.func @transform_6(%arg0: i32) -> (i32, i32, i32) {
    %c0_i32 = arith.constant 0 : i32
    %c0_i32_0 = arith.constant 0 : i32
    %c0_i32_1 = arith.constant 0 : i32
    %c0_i32_2 = arith.constant 0 : i32
    return %c0_i32, %c0_i32_0, %c0_i32_1 : i32, i32, i32
  }
  func.func @transform_7(%arg0: i32) -> (i32, i32, i32) {
    %c0_i32 = arith.constant 0 : i32
    %c0_i32_0 = arith.constant 0 : i32
    %c0_i32_1 = arith.constant 0 : i32
    %c0_i32_2 = arith.constant 0 : i32
    return %c0_i32, %c0_i32_0, %c0_i32_1 : i32, i32, i32
  }
  func.func @transform_8(%arg0: i32) -> (i32, i32) {
    %c0_i32 = arith.constant 0 : i32
    %c0_i32_0 = arith.constant 0 : i32
    %c0_i32_1 = arith.constant 0 : i32
    return %c0_i32, %c0_i32_0 : i32, i32
  }
  func.func @transform_9(%arg0: i32) -> (i32, i32, i32) {
    %c0_i32 = arith.constant 0 : i32
    %c0_i32_0 = arith.constant 0 : i32
    %c0_i32_1 = arith.constant 0 : i32
    return %arg0, %c0_i32, %c0_i32_0 : i32, i32, i32
  }
}

</mosaic_0001>

<bundles_post_ra>
// kernel: upsampling_block_forward.1
= control target key start
LH: loop header
LB: loop body
LE: loop exit
PB: predicated region body
PF: predicated region fallthrough
CT: control target
= control target key end

     0   :  { %14 = vsyncpa [#allocation3], 0  ;;  %s1906_s0 = inlined_call_operand.vmem [shape: bf16[2,4,512], index: 0, kind: input, shape index: {}]   ;;  %s1907_s1 = inlined_call_operand.vmem [shape: bf16[2,4,256], index: 1, kind: input, shape index: {}]   ;;  %s1908_s2 = inlined_call_operand.vmem [shape: bf16[5,4,4], index: 2, kind: input, shape index: {}]   ;;  %s1909_s3 = inlined_call_operand.vmem [shape: f32[4,1], index: 3, kind: input, shape index: {}]   ;;  %s1910_s4 = inlined_call_operand.vmem [shape: bf16[5,8,4], index: 4, kind: input, shape index: {}]   ;;  %s1911_s5 = inlined_call_operand.vmem [shape: f32[8,1], index: 5, kind: input, shape index: {}]   ;;  %s1912_s6 = inlined_call_operand.vmem [shape: bf16[5,8,4], index: 6, kind: input, shape index: {}]   ;;  %s1913_s7 = inlined_call_operand.vmem [shape: bf16[5,8,8], index: 7, kind: input, shape index: {}]   ;;  %s1914_s8 = inlined_call_operand.vmem [shape: f32[8,1], index: 8, kind: input, shape index: {}]   ;;  %s1915_s9 = inlined_call_operand.hbm [shape: f32[2,8,19], index: 9, kind: output, shape index: {}]  }
   0x1   :  { %16 = vsyncpa [#allocation3 + $0x1], 0  ;;  %s1593_s30 = smov 0   ;;  %s1595_s10 = smov 0  }
   0x2   :  { %s1597_s11 = smov 0   ;;  %s1599_s12 = smov 0  }
   0x3 LB: > { %s1614_s13 = sadd.s32 4294967295, %s1536_s12   ;;  %s1361_s14 = sadd.s32 4294967294, %s1536_s12   ;;  %s1536_s12 = sphi %s1599_s12, %s1921_s12   ;;  %s1532_s11 = sphi %s1597_s11, %s1920_s11   ;;  %s1528_s10 = sphi %s1595_s10, %s1919_s10   ;;  %s1524_s30 = sphi %s1593_s30, %s1918_s30  }
   0x4   : > { %s1618_s15 = sadd.s32 1, %s1536_s12   ;;  %s228_s16 = sadd.s32 1, %s1532_s11 }
   0x5   : > { %s225_s17 = ssub.s32 %s1536_s12, %s1618_s15  ;;  %p238_p0 = scmp.ne.s32.totalorder %s1532_s11, %s1528_s10 }
   0x6   : > { %p226_p1 = scmp.eq.s32.totalorder %s225_s17, 0  ;;  %p239_p2 = scmp.eq.s32.totalorder %s1614_s13, 1 }
   0x7   : > { %p244_p3 = scmp.ne.s32.totalorder %s1528_s10, %s1524_s30  ;;  %p245_p4 = scmp.eq.s32.totalorder %s1361_s14, 1 }
   0x8   : > { %s1629_s18 = scalar_select %p226_p1, %s1532_s11, %s228_s16  }
   0x9   : > { %p1631_p5 = por %p239_p2, %p238_p0  ;;  %p1635_p6 = por %p245_p4, %p244_p3 }
   0xa   : > { %p1364_p7 = scmp.ge.s32.totalorder %s1536_s12, 1  ;;  %p300_p8 = scmp.lt.s32.totalorder %s1536_s12, 3 }
   0xc   : > { %p301_p9 = pnand %p1364_p7, %p300_p8 }
   0xd   : > { %p341_p10 = scmp.lt.s32.totalorder (!%p301_p9), %s1614_s13, 1  ;;  %s1538_s26 = smov (!%p301_p9), 127  }
   0xe   : > { %304 = sbr.rel (%p301_p9) target bundleno = 934 (0x3a6), region = 56  ;;  %s1539_s27 = smov (!%p301_p9), 126  }
   0xf   : > { %s1540_s28 = smov (!%p301_p9), 125   ;;  %s338_s16 = sand.u32 (!%p301_p9), 1, %s1528_s10  }
  0x13   : > { %s1643_s21 = scalar_select %p341_p10, %s1614_s13, 1  ;;  %vm382_vm0 = vcmask 1041408   ;;  %v353_v22 = vld [vmem:[%s1908_s2] sm:$0x3]  ;;  %vm378_vm1 = vcmask 31744   ;;  %vm502_vm2 = vcmask 1031168  }
  0x14   : > { %vm374_vm3 = vcmask 1039360   ;;  %v1370_v39 = vld [vmem:[%s1908_s2 + $0x2] sm:$0x3]  ;;  %v1377_v46 = vld [vmem:[%s1908_s2 + $0x4] sm:$0x3]  ;;  %vm579_vm4 = vcmask 1022976  }
  0x15   : > { %s1425_s22 = sshll.u32 %s1643_s21, 3  ;;  %s1426_s29 = sshll.u32 %s1643_s21, 2  ;;  %v714_v57 = vld [vmem:[%s1909_s3] sm:$0xf]  ;;  %v1542_v58 = vmov 0   ;;  %vm656_vm5 = vcmask 1014784  }
  0x16   : > { %s345_s25 = scalar_lea.vmem %s1906_s0, %s1425_s22  ;;  %s350_s17 = scalar_lea.vmem %s1907_s1, %s1426_s29  ;;  %1471 = vset.pattern.permute.xlu1 %v1542_v58  ;;  %1472 = vset.pattern.permute.xlu2 %v1542_v58  ;;  %v1381_v62 = vld [vmem:[%s1908_s2 + $0x6] sm:$0x3]  ;;  %vm1144_vm11 = vcmask 1043456   ;;  %vm1140_vm12 = vcmask 64512   ;;  %vm1272_vm14 = vcmask 154624  }
  0x17   : > { %v352_v0 = vld [vmem:[%s345_s25] sm:$0xff]  ;;  %s1541_s22 = smov 124   ;;  %1473 = vset.pattern.permute.xlu0 %v1542_v58  ;;  %s1422_s21 = sshll.u32 %s1614_s13, 3 }
  0x18   : > { %357 = vst [vmem:[#allocation1] ss:$4 sm:$0xff] %v352_v0  ;;  %v1663_v16 = vld [vmem:[%s350_s17] sm:$0xf]  ;;  %s1365_s17 = sshll.u32 %s338_s16, 3  ;;  %s1275_s13 = scalar_lea.sflag [#allocation3], %s338_s16 }
  0x1f   : > { %v362_v1 = vld.sshfl [vmem:[#allocation1 + $0x10] sm:$0xff pattern:$0x73625140]  ;;  %v358_v2 = vld.sshfl [vmem:[#allocation1] sm:$0xff pattern:$0x73625140] }
  0x20   : > { %370 = vrot.lane.b32.xlu1 %v362_v1, %s1538_s26  ;;  %366 = vrot.lane.b32.xlu0 %v358_v2, %s1538_s26  ;;  %v364_v3 = vld.sshfl [vmem:[#allocation1 + $0x18] sm:$0xff pattern:$0x73625140]  ;;  %v360_v4 = vld.sshfl [vmem:[#allocation1 + $0x8] sm:$0xff pattern:$0x73625140] }
  0x21   : > { %431 = vst [vmem:[#allocation1] ss:$4 sm:$0xff] %v352_v0 }
  0x28   : > { %372 = vrot.lane.b32.xlu1 %v364_v3, %s1538_s26  ;;  %368 = vrot.lane.b32.xlu0 %v360_v4, %s1538_s26  ;;  %v432_v5 = vld.sshfl [vmem:[#allocation1] sm:$0xff pattern:$0x73625140]  ;;  %v433_v6 = vld.sshfl [vmem:[#allocation1 + $0x8] sm:$0xff pattern:$0x73625140] }
  0x29   : > { %v434_v7 = vld.sshfl [vmem:[#allocation1 + $0x10] sm:$0xff pattern:$0x73625140]  ;;  %v438_v21 = vsel %vm382_vm0, %v432_v5, 0  ;;  %v440_v30 = vsel %vm382_vm0, %v433_v6, 0 }
  0x2a   : > { %485 = vst [vmem:[#allocation1] ss:$4 sm:$0xff] %v352_v0  ;;  %451 = vmatpush.bf16.msra.mxu3 %v438_v21  ;;  %v442_v34 = vsel %vm382_vm0, %v434_v7, 0  ;;  %v1385_v6 = vld [vmem:[%s1908_s2 + $0x8] sm:$0x3] }
  0x2d   : > { %1374 = vmatmul.msk.bf16.vlgmr.msra.gmra.mxu3 %vm378_vm1, %v353_v22 }
  0x31   : > { %v488_v8 = vld.sshfl [vmem:[#allocation1 + $0x8] sm:$0xff pattern:$0x73625140]  ;;  %v490_v9 = vld.sshfl [vmem:[#allocation1 + $0x10] sm:$0xff pattern:$0x73625140] }
  0x32   : > { %498 = vrot.lane.b32.xlu0 %v490_v9, %s1539_s27  ;;  %v492_v10 = vld.sshfl [vmem:[#allocation1 + $0x18] sm:$0xff pattern:$0x73625140]  ;;  %v486_v11 = vld.sshfl [vmem:[#allocation1] sm:$0xff pattern:$0x73625140] }
  0x33   : > { %500 = vrot.lane.b32.xlu1 %v492_v10, %s1539_s27  ;;  %494 = vrot.lane.b32.xlu2 %v486_v11, %s1539_s27  ;;  %562 = vst [vmem:[#allocation1] ss:$4 sm:$0xff] %v352_v0 }
  0x3a   : > { %v567_v12 = vld.sshfl [vmem:[#allocation1 + $0x10] sm:$0xff pattern:$0x73625140]  ;;  %v569_v13 = vld.sshfl [vmem:[#allocation1 + $0x18] sm:$0xff pattern:$0x73625140] }
  0x3b   : > { %575 = vrot.lane.b32.xlu1 %v567_v12, %s1540_s28  ;;  %v563_v14 = vld.sshfl [vmem:[#allocation1] sm:$0xff pattern:$0x73625140]  ;;  %496 = vrot.lane.b32.xlu2 %v488_v8, %s1539_s27  ;;  %v565_v15 = vld.sshfl [vmem:[#allocation1 + $0x8] sm:$0xff pattern:$0x73625140] }
  0x3c   : > { %573 = vrot.lane.b32.xlu0 %v565_v15, %s1540_s28  ;;  %639 = vst [vmem:[#allocation1] ss:$4 sm:$0xff] %v352_v0 }
  0x43   : > { %v642_v17 = vld.sshfl [vmem:[#allocation1 + $0x8] sm:$0xff pattern:$0x73625140]  ;;  %v640_v18 = vld.sshfl [vmem:[#allocation1] sm:$0xff pattern:$0x73625140]  ;;  %571 = vrot.lane.b32.xlu2 %v563_v14, %s1540_s28 }
  0x44   : > { %650 = vrot.lane.b32.xlu1 %v642_v17, %s1541_s22  ;;  %648 = vrot.lane.b32.xlu0 %v640_v18, %s1541_s22  ;;  %v646_v19 = vld.sshfl [vmem:[#allocation1 + $0x18] sm:$0xff pattern:$0x73625140]  ;;  %v644_v20 = vld.sshfl [vmem:[#allocation1 + $0x10] sm:$0xff pattern:$0x73625140] }
  0x45   : > { %984 = vst [vmem:[#allocation1] ss:$4 sm:$0xff] %v1663_v16 }
  0x4b   : > { %577 = vrot.lane.b32.xlu2 %v569_v13, %s1540_s28 }
  0x4c   : > { %654 = vrot.lane.b32.xlu0 %v646_v19, %s1541_s22  ;;  %717 = vperm.xlu1 %1471, %v714_v57  }
  0x53   : > { %652 = vrot.lane.b32.xlu2 %v644_v20, %s1541_s22 }
  0x8d   : > { %v495_v23 = vpop.permute.xlu2 %494 }
  0x92   : > { %v371_v24 = vpop.permute.xlu1 %370  ;;  %v367_v25 = vpop.permute.xlu0 %366 }
  0x95   : > { %v497_v26 = vpop.permute.xlu2 %496 }
  0x96   : > { %v503_v27 = vsel %vm502_vm2, %v495_v23, %v497_v26 }
  0x97   : > { %v510_v38 = vsel %vm382_vm0, %v503_v27, 0 }
  0x9a   : > { %v373_v28 = vpop.permute.xlu1 %372  ;;  %v369_v29 = vpop.permute.xlu0 %368 }
  0x9b   : > { %v375_v31 = vsel %vm374_vm3, %v367_v25, %v369_v29  ;;  %v376_v32 = vsel %vm374_vm3, %v369_v29, %v371_v24  ;;  %v377_v33 = vsel %vm374_vm3, %v371_v24, %v373_v28 }
  0x9c   : > { %v384_v35 = vsel %vm382_vm0, %v375_v31, 0  ;;  %v387_v36 = vsel %vm382_vm0, %v376_v32, 0  ;;  %v390_v37 = vsel %vm382_vm0, %v377_v33, 0 }
  0x9d   : > { %399 = vmatpush.bf16.msra.mxu0 %v384_v35  ;;  %412 = vmatpush.bf16.msra.mxu1 %v387_v36  ;;  %v572_v40 = vpop.permute.xlu2 %571 }
  0x9e   : > { %425 = vmatpush.bf16.msra.mxu2 %v390_v37 }
  0xa0   : > { %1371 = vmatmul.msk.bf16.vlgmr.msra.gmra.mxu0 %vm378_vm1, %v1370_v39  ;;  %1372 = vmatmul.msk.bf16.vlgmr.msra.gmra.mxu1 %vm378_vm1, %v1370_v39 }
  0xa1   : > { %464 = vmatpush.bf16.msrb.mxu0 %v440_v30  ;;  %477 = vmatpush.bf16.msrb.mxu1 %v442_v34 }
  0xa2   : > { %525 = vmatpush.bf16.msrb.mxu2 %v510_v38 }
  0xa3   : > { %1373 = vmatmul.msk.bf16.vlgmr.msra.gmra.mxu2 %vm378_vm1, %v1370_v39 }
  0xa4   : > { %v499_v41 = vpop.permute.xlu0 %498 }
  0xa5   : > { %v504_v42 = vsel %vm502_vm2, %v497_v26, %v499_v41  ;;  %v501_v43 = vpop.permute.xlu1 %500  ;;  %v578_v48 = vpop.permute.xlu2 %577 }
  0xa6   : > { %v513_v44 = vsel %vm382_vm0, %v504_v42, 0  ;;  %v505_v45 = vsel %vm502_vm2, %v499_v41, %v501_v43 }
  0xa7   : > { %538 = vmatpush.bf16.msrb.mxu3 %v513_v44  ;;  %v516_v47 = vsel %vm382_vm0, %v505_v45, 0 }
  0xa8   : > { %551 = vmatpush.bf16.msra.mxu0 %v516_v47 }
  0xaa   : > { %1379 = vmatmul.msk.bf16.vlgmr.msrb.gmra.mxu3 %vm378_vm1, %v1377_v46 }
  0xad   : > { %v576_v49 = vpop.permute.xlu1 %575  ;;  %v653_v59 = vpop.permute.xlu2 %652 }
  0xae   : > { %v582_v50 = vsel %vm579_vm4, %v576_v49, %v578_v48  ;;  %v574_v51 = vpop.permute.xlu0 %573 }
  0xaf   : > { %v593_v52 = vsel %vm382_vm0, %v582_v50, 0  ;;  %v580_v53 = vsel %vm579_vm4, %v572_v40, %v574_v51  ;;  %v581_v54 = vsel %vm579_vm4, %v574_v51, %v576_v49 }
  0xb0   : > { %1375 = vmatmul.msk.bf16.vlgmr.msrb.gmra.mxu0 %vm378_vm1, %v353_v22  ;;  %1376 = vmatmul.msk.bf16.vlgmr.msrb.gmra.mxu1 %vm378_vm1, %v353_v22  ;;  %v587_v55 = vsel %vm382_vm0, %v580_v53, 0  ;;  %v590_v56 = vsel %vm382_vm0, %v581_v54, 0  ;;  %v453_v7 = vpop.f32.mrf.mxu3 }
  0xb1   : > { %628 = vmatpush.bf16.msra.mxu3 %v593_v52  ;;  %602 = vmatpush.bf16.msra.mxu1 %v587_v55 }
  0xb2   : > { %615 = vmatpush.bf16.msra.mxu2 %v590_v56 }
  0xb3   : > { %1378 = vmatmul.msk.bf16.vlgmr.msrb.gmra.mxu2 %vm378_vm1, %v1377_v46 }
  0xb6   : > { %v651_v60 = vpop.permute.xlu1 %650  ;;  %v649_v61 = vpop.permute.xlu0 %648 }
  0xb7   : > { %v657_v63 = vsel %vm656_vm5, %v649_v61, %v651_v60  ;;  %v658_v0 = vsel %vm656_vm5, %v651_v60, %v653_v59 }
  0xb8   : > { %v664_v1 = vsel %vm382_vm0, %v657_v63, 0  ;;  %v667_v2 = vsel %vm382_vm0, %v658_v0, 0  ;;  %v455_v8 = vpop.f32.mrf.mxu3 }
  0xb9   : > { %679 = vmatpush.bf16.msrb.mxu0 %v664_v1  ;;  %692 = vmatpush.bf16.msrb.mxu1 %v667_v2 }
  0xba   : > { %1384 = vmatmul.msk.bf16.vlgmr.msra.gmra.mxu3 %vm378_vm1, %v1381_v62 }
  0xbe   : > { %v655_v3 = vpop.permute.xlu0 %654  ;;  %v718_v38 = vpop.permute.xlu1 %717 }
  0xbf   : > { %v659_v4 = vsel %vm656_vm5, %v653_v59, %v655_v3 }
  0xc0   : > { %1380 = vmatmul.msk.bf16.vlgmr.msra.gmra.mxu0 %vm378_vm1, %v1377_v46  ;;  %1382 = vmatmul.msk.bf16.vlgmr.msra.gmra.mxu1 %vm378_vm1, %v1381_v62  ;;  %v670_v5 = vsel %vm382_vm0, %v659_v4, 0 }
  0xc1   : > { %705 = vmatpush.bf16.msrb.mxu2 %v670_v5 }
  0xc3   : > { %1383 = vmatmul.msk.bf16.vlgmr.msra.gmra.mxu2 %vm378_vm1, %v1381_v62 }
  0xd0   : > { %1386 = vmatmul.msk.bf16.vlgmr.msrb.gmra.mxu0 %vm378_vm1, %v1385_v6  ;;  %1387 = vmatmul.msk.bf16.vlgmr.msrb.gmra.mxu1 %vm378_vm1, %v1385_v6 }
  0xd3   : > { %1388 = vmatmul.msk.bf16.vlgmr.msrb.gmra.mxu2 %vm378_vm1, %v1385_v6  ;;  %v734_v6 = vld [vmem:[%s1910_s4] sm:$0xf] }
 0x11d   : > { %v401_v9 = vpop.f32.mrf.mxu0  ;;  %v414_v10 = vpop.f32.mrf.mxu1 }
 0x11e   : > { %v454_v32 = vadd.f32 %v453_v7, %v401_v9 }
 0x125   : > { %v403_v12 = vpop.f32.mrf.mxu0  ;;  %v416_v13 = vpop.f32.mrf.mxu1 }
 0x126   : > { %v427_v11 = vpop.f32.mrf.mxu2  ;;  %v1389_v12 = vld [vmem:[%s1910_s4 + $0x4] sm:$0xf] }
 0x12d   : > { %v466_v15 = vpop.f32.mrf.mxu0  ;;  %v479_v17 = vpop.f32.mrf.mxu1 }
 0x12e   : > { %v429_v14 = vpop.f32.mrf.mxu2  ;;  %v540_v18 = vpop.f32.mrf.mxu3  ;;  %v467_v30 = vadd.f32 %v466_v15, %v414_v10  ;;  %v480_v39 = vadd.f32 %v479_v17, %v427_v11 }
 0x130   : > { %v558_v33 = vadd.f32 %v540_v18, %v467_v30  ;;  %v1394_v30 = vld [vmem:[%s1910_s4 + $0x8] sm:$0xf] }
 0x135   : > { %v468_v20 = vpop.f32.mrf.mxu0  ;;  %v481_v21 = vpop.f32.mrf.mxu1 }
 0x136   : > { %v527_v19 = vpop.f32.mrf.mxu2  ;;  %v542_v22 = vpop.f32.mrf.mxu3  ;;  %v985_v21 = vld.sshfl [vmem:[#allocation1] sm:$0xff pattern:$0x73625140] }
 0x137   : > { %v557_v34 = vadd.f32 %v527_v19, %v454_v32  ;;  %v987_v22 = vld.sshfl [vmem:[#allocation1 + $0x8] sm:$0xff pattern:$0x73625140] }
 0x138   : > { %1033 = vst [vmem:[#allocation1] ss:$4 sm:$0xff] %v1663_v16 }
 0x13d   : > { %v553_v24 = vpop.f32.mrf.mxu0  ;;  %v604_v25 = vpop.f32.mrf.mxu1 }
 0x13e   : > { %v529_v23 = vpop.f32.mrf.mxu2  ;;  %v630_v26 = vpop.f32.mrf.mxu3  ;;  %v634_v35 = vadd.f32 %v604_v25, %v557_v34  ;;  %v559_v44 = vadd.f32 %v553_v24, %v480_v39 }
 0x13f   : > { %v964_v23 = vld [vmem:[%s1911_s5] sm:$0xff]  ;;  %v1036_v32 = vld.sshfl [vmem:[#allocation1 + $0x8] sm:$0xff pattern:$0x73625140] }
 0x140   : > { %v636_v49 = vadd.f32 %v630_v26, %v559_v44  ;;  %v1400_v44 = vld [vmem:[%s1910_s4 + $0x10] sm:$0xf] }
 0x145   : > { %v555_v28 = vpop.f32.mrf.mxu0  ;;  %v606_v29 = vpop.f32.mrf.mxu1 }
 0x146   : > { %v617_v27 = vpop.f32.mrf.mxu2  ;;  %v632_v31 = vpop.f32.mrf.mxu3 }
 0x147   : > { %v635_v36 = vadd.f32 %v617_v27, %v558_v33  ;;  %v1397_v31 = vld [vmem:[%s1910_s4 + $0xc] sm:$0xf]  ;;  %v1034_v33 = vld.sshfl [vmem:[#allocation1] sm:$0xff pattern:$0x73625140] }
 0x148   : > { %1065 = vst [vmem:[#allocation1] ss:$4 sm:$0xff] %v1663_v16 }
 0x14d   : > { %v681_v40 = vpop.f32.mrf.mxu0  ;;  %v694_v41 = vpop.f32.mrf.mxu1 }
 0x14e   : > { %v619_v37 = vpop.f32.mrf.mxu2  ;;  %v711_v42 = vadd.f32 %v681_v40, %v634_v35  ;;  %v712_v43 = vadd.f32 %v694_v41, %v635_v36 }
 0x150   : > { %v720_v45 = vadd.f32 %v718_v38, %v711_v42  ;;  %v721_v46 = vadd.f32 %v718_v38, %v712_v43 }
 0x152   : > { %vm723_vm6 = vcmp.ge.f32.partialorder %v720_v45, 0.0  ;;  %vm724_vm7 = vcmp.ge.f32.partialorder %v721_v46, 0.0  ;;  %v726_v47 = vmul.f32 0.01, %v720_v45  ;;  %v727_v48 = vmul.f32 0.01, %v721_v46 }
 0x154   : > { %v729_v50 = vsel %vm723_vm6, %v720_v45, %v726_v47  ;;  %v730_v51 = vsel %vm724_vm7, %v721_v46, %v727_v48 }
 0x155   : > { %v732_v53 = vpack.c.bf16 %v730_v51, %v729_v50  ;;  %v683_v55 = vpop.f32.mrf.mxu0  ;;  %v696_v56 = vpop.f32.mrf.mxu1  ;;  %v1066_v50 = vld.sshfl [vmem:[#allocation1] sm:$0xff pattern:$0x73625140] }
 0x156   : > { %v707_v52 = vpop.f32.mrf.mxu2 }
 0x157   : > { %v713_v54 = vadd.f32 %v707_v52, %v636_v49  ;;  %v739_v57 = vunpack.c.l.b16 %v732_v53  ;;  %v740_v58 = vunpack.c.h.b16 %v732_v53  ;;  %v1068_v49 = vld.sshfl [vmem:[#allocation1 + $0x8] sm:$0xff pattern:$0x73625140] }
 0x158   : > { %1097 = vst [vmem:[#allocation1] ss:$4 sm:$0xff] %v1663_v16 }
 0x159   : > { %v722_v59 = vadd.f32 %v718_v38, %v713_v54  ;;  %v742_v60 = vpack.c.b16 %v739_v57, %v739_v57  ;;  %v743_v61 = vpack.c.b16 %v740_v58, %v740_v58 }
 0x15b   : > { %vm725_vm8 = vcmp.ge.f32.partialorder %v722_v59, 0.0  ;;  %v728_v62 = vmul.f32 0.01, %v722_v59  ;;  %747 = vrot.lane.b32.xlu0 %v743_v61, %s1538_s26  ;;  %745 = vrot.lane.b32.xlu2 %v742_v60, %s1538_s26  ;;  %v792_v0 = vsel %vm382_vm0, %v742_v60, 0  ;;  %v795_v1 = vsel %vm382_vm0, %v743_v61, 0 }
 0x15c   : > { %804 = vmatpush.bf16.msra.mxu1 %v792_v0  ;;  %817 = vmatpush.bf16.msra.mxu2 %v795_v1 }
 0x15d   : > { %v731_v63 = vsel %vm725_vm8, %v722_v59, %v728_v62 }
 0x15e   : > { %v733_v2 = vpack.c.bf16 %v731_v63, %v731_v63  ;;  %v709_v3 = vpop.f32.mrf.mxu2 }
 0x15f   : > { %1393 = vmatmul.msk.bf16.vlgmr.msra.gmra.mxu2 %vm378_vm1, %v734_v6  ;;  %1392 = vmatmul.msk.bf16.vlgmr.msra.gmra.mxu1 %vm378_vm1, %v734_v6  ;;  %v1100_v55 = vld.sshfl [vmem:[#allocation1 + $0x8] sm:$0xff pattern:$0x73625140] }
 0x160   : > { %v741_v4 = vunpack.c.l.b16 %v733_v2 }
 0x162   : > { %v744_v5 = vpack.c.b16 %v741_v4, %v741_v4 }
 0x163   : > { %827 = vrot.lane.b32.xlu0 %v743_v61, %s1539_s27  ;;  %825 = vrot.lane.b32.xlu2 %v742_v60, %s1539_s27 }
 0x164   : > { %749 = vrot.lane.b32.xlu1 %v744_v5, %s1538_s26 }
 0x16b   : > { %876 = vrot.lane.b32.xlu0 %v744_v5, %s1540_s28  ;;  %874 = vrot.lane.b32.xlu2 %v743_v61, %s1540_s28 }
 0x16c   : > { %829 = vrot.lane.b32.xlu1 %v744_v5, %s1539_s27 }
 0x173   : > { %872 = vrot.lane.b32.xlu0 %v742_v60, %s1540_s28  ;;  %921 = vrot.lane.b32.xlu2 %v743_v61, %s1541_s22 }
 0x174   : > { %919 = vrot.lane.b32.xlu1 %v742_v60, %s1541_s22 }
 0x17b   : > { %989 = vrot.lane.b32.xlu0 %v985_v21, %s1538_s26  ;;  %967 = vperm.xlu2 %1472, %v964_v23  }
 0x17c   : > { %923 = vrot.lane.b32.xlu1 %v744_v5, %s1541_s22 }
 0x183   : > { %1040 = vrot.lane.b32.xlu0 %v1036_v32, %s1539_s27  ;;  %1038 = vrot.lane.b32.xlu2 %v1034_v33, %s1539_s27  ;;  %v1262_v32 = vld [vmem:[%s1914_s8] sm:$0xff] }
 0x184   : > { %991 = vrot.lane.b32.xlu1 %v987_v22, %s1538_s26 }
 0x18b   : > { %1070 = vrot.lane.b32.xlu0 %v1066_v50, %s1540_s28 }
 0x193   : > { %1104 = vrot.lane.b32.xlu0 %v1100_v55, %s1541_s22 }
 0x1b5   : > { %v746_v7 = vpop.permute.xlu2 %745 }
 0x1bd   : > { %v826_v11 = vpop.permute.xlu2 %825 }
 0x1c5   : > { %v875_v20 = vpop.permute.xlu2 %874 }
 0x1cd   : > { %v748_v8 = vpop.permute.xlu0 %747  ;;  %v922_v34 = vpop.permute.xlu2 %921 }
 0x1ce   : > { %v751_v9 = vsel %vm374_vm3, %v746_v7, %v748_v8 }
 0x1cf   : > { %v757_v10 = vsel %vm382_vm0, %v751_v9, 0 }
 0x1d0   : > { %769 = vmatpush.bf16.msrb.mxu3 %v757_v10 }
 0x1d3   : > { %1390 = vmatmul.msk.bf16.vlgmr.msrb.gmra.mxu3 %vm378_vm1, %v1389_v12 }
 0x1d5   : > { %v828_v15 = vpop.permute.xlu0 %827  ;;  %v968_v52 = vpop.permute.xlu2 %967 }
 0x1d6   : > { %v750_v13 = vpop.permute.xlu1 %749  ;;  %v831_v18 = vsel %vm502_vm2, %v826_v11, %v828_v15 }
 0x1d7   : > { %v752_v14 = vsel %vm374_vm3, %v748_v8, %v750_v13  ;;  %v837_v19 = vsel %vm382_vm0, %v831_v18, 0 }
 0x1d8   : > { %v760_v17 = vsel %vm382_vm0, %v752_v14, 0  ;;  %849 = vmatpush.bf16.msra.mxu3 %v837_v19 }
 0x1d9   : > { %782 = vmatpush.bf16.msra.mxu0 %v760_v17 }
 0x1dc   : > { %1391 = vmatmul.msk.bf16.vlgmr.msra.gmra.mxu0 %vm378_vm1, %v1389_v12  ;;  %v806_v45 = vpop.f32.mrf.mxu1 }
 0x1dd   : > { %v877_v26 = vpop.permute.xlu0 %876  ;;  %v1039_v59 = vpop.permute.xlu2 %1038 }
 0x1de   : > { %v830_v24 = vpop.permute.xlu1 %829  ;;  %v879_v28 = vsel %vm579_vm4, %v875_v20, %v877_v26 }
 0x1df   : > { %v832_v25 = vsel %vm502_vm2, %v828_v15, %v830_v24  ;;  %v887_v29 = vsel %vm382_vm0, %v879_v28, 0 }
 0x1e0   : > { %v840_v27 = vsel %vm382_vm0, %v832_v25, 0  ;;  %909 = vmatpush.bf16.msrb.mxu2 %v887_v29 }
 0x1e1   : > { %862 = vmatpush.bf16.msrb.mxu0 %v840_v27 }
 0x1e2   : > { %v819_v46 = vpop.f32.mrf.mxu2 }
 0x1e3   : > { %1395 = vmatmul.msk.bf16.vlgmr.msra.gmra.mxu3 %vm378_vm1, %v1394_v30  ;;  %1399 = vmatmul.msk.bf16.vlgmr.msrb.gmra.mxu2 %vm378_vm1, %v1397_v31 }
 0x1e4   : > { %v808_v47 = vpop.f32.mrf.mxu1 }
 0x1e5   : > { %v873_v37 = vpop.permute.xlu0 %872 }
 0x1e6   : > { %v920_v35 = vpop.permute.xlu1 %919  ;;  %v878_v39 = vsel %vm579_vm4, %v873_v37, %v875_v20  ;;  %v980_v37 = vld [vmem:[%s1912_s6] sm:$0xf] }
 0x1e7   : > { %v925_v36 = vsel %vm656_vm5, %v920_v35, %v922_v34  ;;  %v884_v40 = vsel %vm382_vm0, %v878_v39, 0  ;;  %v1016_v35 = vsel %vm382_vm0, %v1663_v16, 0  ;;  %v1406_v16 = vld [vmem:[%s1912_s6 + $0x8] sm:$0xf] }
 0x1e8   : > { %v931_v38 = vsel %vm382_vm0, %v925_v36, 0  ;;  %896 = vmatpush.bf16.msrb.mxu1 %v884_v40  ;;  %1025 = vmatpush.bf16.msra.mxu2 %v1016_v35 }
 0x1e9   : > { %943 = vmatpush.bf16.msrb.mxu3 %v931_v38  ;;  %v1403_v38 = vld [vmem:[%s1912_s6 + $0x4] sm:$0xf] }
 0x1ea   : > { %v821_v48 = vpop.f32.mrf.mxu2 }
 0x1eb   : > { %1398 = vmatmul.msk.bf16.vlgmr.msrb.gmra.mxu1 %vm378_vm1, %v1397_v31  ;;  %v1098_v31 = vld.sshfl [vmem:[#allocation1] sm:$0xff pattern:$0x73625140] }
 0x1ec   : > { %1396 = vmatmul.msk.bf16.vlgmr.msrb.gmra.mxu0 %vm378_vm1, %v1394_v30 }
 0x1ed   : > { %v1798_v51 = vpop.permute.xlu0 %989 }
 0x1ee   : > { %v924_v41 = vpop.permute.xlu1 %923 }
 0x1ef   : > { %v926_v42 = vsel %vm656_vm5, %v922_v34, %v924_v41  ;;  %v1127_v41 = vld [vmem:[%s1913_s7] sm:$0xf] }
 0x1f0   : > { %v934_v43 = vsel %vm382_vm0, %v926_v42, 0 }
 0x1f1   : > { %956 = vmatpush.bf16.msra.mxu0 %v934_v43 }
 0x1f3   : > { %1401 = vmatmul.msk.bf16.vlgmr.msrb.gmra.mxu3 %vm378_vm1, %v1400_v44  ;;  %1405 = vmatmul.msk.bf16.vlgmr.msra.gmra.mxu2 %vm378_vm1, %v980_v37 }
 0x1f5   : > { %v1041_v57 = vpop.permute.xlu0 %1040 }
 0x1f6   : > { %v1042_v60 = vsel %vm502_vm2, %v1039_v59, %v1041_v57  ;;  %v992_v33 = vpop.permute.xlu1 %991 }
 0x1f7   : > { %v1047_v61 = vsel %vm382_vm0, %v1042_v60, 0  ;;  %v993_v34 = vsel %vm374_vm3, %v1798_v51, %v992_v33  ;;  %v1417_v60 = vld [vmem:[%s1913_s7 + $0xc] sm:$0xf] }
 0x1f8   : > { %1056 = vmatpush.bf16.msra.mxu3 %v1047_v61  ;;  %v998_v36 = vsel %vm382_vm0, %v993_v34, 0  ;;  %v1408_v61 = vld [vmem:[%s1912_s6 + $0xc] sm:$0xf] }
 0x1f9   : > { %1007 = vmatpush.bf16.msra.mxu1 %v998_v36 }
 0x1fc   : > { %1402 = vmatmul.msk.bf16.vlgmr.msra.gmra.mxu0 %vm378_vm1, %v1400_v44  ;;  %1404 = vmatmul.msk.bf16.vlgmr.msra.gmra.mxu1 %vm378_vm1, %v1403_v38 }
 0x1fd   : > { %v1071_v39 = vpop.permute.xlu0 %1070 }
 0x203   : > { %1407 = vmatmul.msk.bf16.vlgmr.msra.gmra.mxu3 %vm378_vm1, %v1406_v16 }
 0x205   : > { %v1105_v43 = vpop.permute.xlu0 %1104 }
 0x256   : > { %v771_v53 = vpop.f32.mrf.mxu3 }
 0x257   : > { %v807_v4 = vadd.f32 %v806_v45, %v771_v53 }
 0x259   : > { %v784_v54 = vpop.f32.mrf.mxu0 }
 0x25a   : > { %v820_v6 = vadd.f32 %v819_v46, %v784_v54  ;;  %v1410_v46 = vld [vmem:[%s1912_s6 + $0x10] sm:$0xf] }
 0x25e   : > { %v773_v56 = vpop.f32.mrf.mxu3 }
 0x261   : > { %v786_v58 = vpop.f32.mrf.mxu0 }
 0x266   : > { %v851_v62 = vpop.f32.mrf.mxu3  ;;  %v911_v63 = vpop.f32.mrf.mxu2 }
 0x267   : > { %v868_v8 = vadd.f32 %v851_v62, %v807_v4 }
 0x268   : > { %v898_v1 = vpop.f32.mrf.mxu1 }
 0x269   : > { %v864_v0 = vpop.f32.mrf.mxu0  ;;  %v915_v10 = vadd.f32 %v898_v1, %v868_v8  ;;  %v1419_v1 = vld [vmem:[%s1913_s7 + $0x10] sm:$0xf] }
 0x26a   : > { %v869_v9 = vadd.f32 %v864_v0, %v820_v6 }
 0x26c   : > { %v916_v11 = vadd.f32 %v911_v63, %v869_v9 }
 0x26e   : > { %v853_v2 = vpop.f32.mrf.mxu3  ;;  %v913_v3 = vpop.f32.mrf.mxu2 }
 0x270   : > { %v900_v7 = vpop.f32.mrf.mxu1 }
 0x271   : > { %v866_v5 = vpop.f32.mrf.mxu0 }
 0x272   : > { %v1415_v5 = vld [vmem:[%s1913_s7 + $0x8] sm:$0xf] }
 0x276   : > { %v945_v12 = vpop.f32.mrf.mxu3  ;;  %v1027_v7 = vpop.f32.mrf.mxu2 }
 0x277   : > { %v962_v13 = vadd.f32 %v945_v12, %v915_v10 }
 0x279   : > { %v958_v14 = vpop.f32.mrf.mxu0  ;;  %v970_v17 = vadd.f32 %v968_v52, %v962_v13  ;;  %v1009_v6 = vpop.f32.mrf.mxu1 }
 0x27a   : > { %v963_v15 = vadd.f32 %v958_v14, %v916_v11  ;;  %v1028_v8 = vadd.f32 %v1027_v7, %v1009_v6 }
 0x27b   : > { %vm972_vm9 = vcmp.ge.f32.partialorder %v970_v17, 0.0  ;;  %v974_v19 = vmul.f32 0.01, %v970_v17 }
 0x27c   : > { %v971_v18 = vadd.f32 %v968_v52, %v963_v15  ;;  %v1412_v52 = vld [vmem:[%s1913_s7 + $0x4] sm:$0xf] }
 0x27d   : > { %v976_v21 = vsel %vm972_vm9, %v970_v17, %v974_v19 }
 0x27e   : > { %vm973_vm10 = vcmp.ge.f32.partialorder %v971_v18, 0.0  ;;  %v975_v20 = vmul.f32 0.01, %v971_v18  ;;  %v947_v23 = vpop.f32.mrf.mxu3  ;;  %v1029_v10 = vpop.f32.mrf.mxu2 }
 0x280   : > { %v977_v22 = vsel %vm973_vm10, %v971_v18, %v975_v20 }
 0x281   : > { %v960_v24 = vpop.f32.mrf.mxu0  ;;  %v978_v25 = vpack.c.bf16 %v977_v22, %v976_v21  ;;  %v1011_v9 = vpop.f32.mrf.mxu1 }
 0x283   : > { %v1165_v26 = vsel %vm1144_vm11, %v978_v25, 0  ;;  %v1132_v27 = vunpack.c.h.b16 %v978_v25  ;;  %v1131_v28 = vunpack.c.l.b16 %v978_v25 }
 0x284   : > { %1174 = vmatpush.bf16.msrb.mxu3 %v1165_v26 }
 0x285   : > { %v1134_v29 = vpack.c.b16 %v1132_v27, %v1132_v27  ;;  %v1133_v30 = vpack.c.b16 %v1131_v28, %v1131_v28 }
 0x286   : > { %v1058_v11 = vpop.f32.mrf.mxu3 }
 0x287   : > { %1137 = vrot.lane.b32.xlu2 %v1134_v29, %s1538_s26  ;;  %1182 = vrot.lane.b32.xlu0 %v1133_v30, %s1539_s27  ;;  %v1062_v25 = vadd.f32 %v1058_v11, %v1028_v8 }
 0x288   : > { %1135 = vrot.lane.b32.xlu1 %v1133_v30, %s1538_s26  ;;  %1414 = vmatmul.msk.bf16.vlgmr.msrb.gmra.mxu3 %vm1140_vm12, %v1127_v41 }
 0x28e   : > { %v1060_v12 = vpop.f32.mrf.mxu3 }
 0x28f   : > { %1102 = vrot.lane.b32.xlu2 %v1098_v31, %s1541_s22  ;;  %1211 = vrot.lane.b32.xlu0 %v1134_v29, %s1540_s28 }
 0x290   : > { %1072 = vrot.lane.b32.xlu1 %v1068_v49, %s1540_s28 }
 0x297   : > { %1238 = vrot.lane.b32.xlu2 %v1134_v29, %s1541_s22 }
 0x298   : > { %1236 = vrot.lane.b32.xlu1 %v1133_v30, %s1541_s22 }
 0x29f   : > { %1209 = vrot.lane.b32.xlu2 %v1133_v30, %s1540_s28  ;;  %s1285_s28 = scalar_lea.hbm %s1915_s9, %s1422_s21 }
 0x2a0   : > { %1184 = vrot.lane.b32.xlu1 %v1134_v29, %s1539_s27  ;;  %s340_s27 = scalar_lea.vmem [#allocation2], %s1365_s17  ;;  %s1289_s24 = sshll.u32 %s1285_s28, 4  ;;  %s1290_s24 = int_to_ptr.hbm [resolvable:$true] %s1289_s24 }
 0x2a1   : > { %s1287_s22 = sshll.u32 %s340_s27, 4  ;;  %s1488_s25 = sshra.s32 %s1290_s24, 4  ;;  %s1288_s22 = int_to_ptr.vmem [resolvable:$true] %s1287_s22  ;;  %s1489_s25 = int_to_ptr.hbm [resolvable:$true] %s1488_s25 }
 0x2a2   : > { %s1490_s29 = scalar_lea.hbm %s1489_s25, 8  ;;  %s1494_s17 = scalar_lea.hbm %s1915_s9, 16 }
 0x2a3   : > { %p1491_p11 = scmp.ne.s32.totalorder %s1489_s25, %s1490_s29  ;;  %p1495_p0 = scmp.lt.s32.totalorder %s1489_s25, %s1915_s9 }
 0x2a4   : > { %p1496_p1 = scmp.lt.s32.totalorder %s1494_s17, %s1490_s29 }
 0x2a5   : > { %p1492_p12 = pnand %p1491_p11, %p1631_p5 }
 0x2a6   : > { %p1497_p2 = por %p1496_p1, %p1495_p0 }
 0x2a7   : > { %p1493_p13 = pneg %p1492_p12 }
 0x2a8   : > { %1265 = vperm.xlu1 %1471, %v1262_v32  }
 0x2a9   : > { %p1498_p3 = pnand %p1497_p2, %p1493_p13 }
 0x2e1   : > { %v1138_v40 = vpop.permute.xlu2 %1137 }
 0x2e9   : > { %v1103_v42 = vpop.permute.xlu2 %1102 }
 0x2ea   : > { %v1106_v44 = vsel %vm656_vm5, %v1103_v42, %v1105_v43 }
 0x2eb   : > { %v1111_v45 = vsel %vm382_vm0, %v1106_v44, 0 }
 0x2ec   : > { %1120 = vmatpush.bf16.msrb.mxu1 %v1111_v45 }
 0x2ef   : > { %1411 = vmatmul.msk.bf16.vlgmr.msrb.gmra.mxu1 %vm378_vm1, %v1410_v46 }
 0x2f1   : > { %v1239_v47 = vpop.permute.xlu2 %1238 }
 0x2f9   : > { %v1183_v48 = vpop.permute.xlu0 %1182  ;;  %v1210_v53 = vpop.permute.xlu2 %1209 }
 0x2fa   : > { %v1136_v49 = vpop.permute.xlu1 %1135 }
 0x2fb   : > { %v1139_v50 = vsel %vm374_vm3, %v1136_v49, %v1138_v40 }
 0x2fc   : > { %v1146_v51 = vsel %vm1144_vm11, %v1139_v50, 0 }
 0x2fd   : > { %1155 = vmatpush.bf16.msrb.mxu2 %v1146_v51 }
 0x300   : > { %1413 = vmatmul.msk.bf16.vlgmr.msrb.gmra.mxu2 %vm1140_vm12, %v1412_v52 }
 0x301   : > { %v1212_v54 = vpop.permute.xlu0 %1211 }
 0x302   : > { %v1213_v55 = vsel %vm579_vm4, %v1210_v53, %v1212_v54  ;;  %v1073_v56 = vpop.permute.xlu1 %1072 }
 0x303   : > { %v1218_v57 = vsel %vm1144_vm11, %v1213_v55, 0  ;;  %v1074_v58 = vsel %vm579_vm4, %v1071_v39, %v1073_v56 }
 0x304   : > { %v1079_v59 = vsel %vm382_vm0, %v1074_v58, 0  ;;  %1227 = vmatpush.bf16.msra.mxu1 %v1218_v57 }
 0x305   : > { %1088 = vmatpush.bf16.msrb.mxu0 %v1079_v59 }
 0x307   : > { %1418 = vmatmul.msk.bf16.vlgmr.msra.gmra.mxu1 %vm1140_vm12, %v1417_v60 }
 0x308   : > { %1409 = vmatmul.msk.bf16.vlgmr.msrb.gmra.mxu0 %vm378_vm1, %v1408_v61 }
 0x30a   : > { %v1237_v62 = vpop.permute.xlu1 %1236 }
 0x30b   : > { %v1240_v63 = vsel %vm656_vm5, %v1237_v62, %v1239_v47  ;;  %v1176_v13 = vpop.f32.mrf.mxu3 }
 0x30c   : > { %v1245_v0 = vsel %vm1144_vm11, %v1240_v63, 0 }
 0x30d   : > { %1254 = vmatpush.bf16.msra.mxu2 %v1245_v0 }
 0x310   : > { %1420 = vmatmul.msk.bf16.vlgmr.msra.gmra.mxu2 %vm1140_vm12, %v1419_v1 }
 0x312   : > { %v1185_v2 = vpop.permute.xlu1 %1184 }
 0x313   : > { %v1186_v3 = vsel %vm502_vm2, %v1183_v48, %v1185_v2  ;;  %v1178_v15 = vpop.f32.mrf.mxu3 }
 0x314   : > { %v1191_v4 = vsel %vm1144_vm11, %v1186_v3, 0 }
 0x315   : > { %1200 = vmatpush.bf16.msra.mxu0 %v1191_v4 }
 0x318   : > { %1416 = vmatmul.msk.bf16.vlgmr.msra.gmra.mxu0 %vm1140_vm12, %v1415_v5 }
 0x31a   : > { %v1266_v35 = vpop.permute.xlu1 %1265 }
 0x36c   : > { %v1122_v14 = vpop.f32.mrf.mxu1 }
 0x374   : > { %v1124_v17 = vpop.f32.mrf.mxu1 }
 0x383   : > { %v1157_v18 = vpop.f32.mrf.mxu2 }
 0x384   : > { %v1229_v19 = vpop.f32.mrf.mxu1  ;;  %v1177_v26 = vadd.f32 %v1176_v13, %v1157_v18 }
 0x385   : > { %v1090_v20 = vpop.f32.mrf.mxu0 }
 0x386   : > { %v1094_v28 = vadd.f32 %v1090_v20, %v1062_v25 }
 0x388   : > { %v1126_v31 = vadd.f32 %v1122_v14, %v1094_v28 }
 0x38b   : > { %v1159_v21 = vpop.f32.mrf.mxu2 }
 0x38c   : > { %v1231_v22 = vpop.f32.mrf.mxu1 }
 0x38d   : > { %v1092_v23 = vpop.f32.mrf.mxu0 }
 0x393   : > { %v1256_v24 = vpop.f32.mrf.mxu2 }
 0x395   : > { %v1202_v27 = vpop.f32.mrf.mxu0 }
 0x396   : > { %v1206_v29 = vadd.f32 %v1202_v27, %v1177_v26 }
 0x398   : > { %v1233_v30 = vadd.f32 %v1229_v19, %v1206_v29 }
 0x39a   : > { %v1260_v32 = vadd.f32 %v1256_v24, %v1233_v30 }
 0x39b   : > { %v1258_v33 = vpop.f32.mrf.mxu2 }
 0x39c   : > { %v1261_v34 = vadd.f32 %v1260_v32, %v1126_v31 }
 0x39d   : > { %v1204_v36 = vpop.f32.mrf.mxu0 }
 0x39e   : > { %v1268_v37 = vadd.f32 %v1266_v35, %v1261_v34 }
 0x3a0   : > { %v1270_v38 = vmul.f32 0.01, %v1268_v37  ;;  %vm1269_vm13 = vcmp.ge.f32.partialorder %v1268_v37, 0.0 }
 0x3a2   : > { %v1271_v16 = vsel %vm1269_vm13, %v1268_v37, %v1270_v38 }
 0x3a3   : > { %1273 = vst.msk [vmem:[%s340_s27] sm:$0xff] %vm1272_vm14, %v1271_v16 }
 0x3a4   : > { %1501 = shalt.err (!%p1498_p3)
}
 0x3a5   : > { %1427 = dma.vmem_to_hbm [thread:$0]  (%p1631_p5), %s1288_s22, 128, %s1290_s24, %s1275_s13  }
 0x3a6 PF: > { %p1433_p4 = scmp.ge.s32.totalorder %s1536_s12, 2  ;;  %s1301_s16 = sand.u32 1, %s1524_s30  }
 0x3a7   : > { %s1302_s28 = scalar_lea.sflag [#allocation3], %s1301_s16 }
 0x3a8   : > { %p1430_p7 = pnand %p1433_p4, %p1635_p6 }
 0x3aa   : > { %p1431_p8 = pneg %p1430_p7 }
 0x3ac   : > { %1519 = dma.done.wait (%p1431_p8), %s1302_s28, 128  }
 0x3ad   : > { %1521 = vsyncadd (%p1431_p8), %s1302_s28, 4294967168  ;;  %p19_p9 = scmp.ge.s32.totalorder %s1618_s15, 4   ;;  %s1918_s30 = smov %s1528_s10 }
 0x3ae   : > { %s1919_s10 = smov %s1532_s11  ;;  %s1920_s11 = smov %s1629_s18 }
 0x3af   : > { %s1921_s12 = smov %s1618_s15  ;;  %21 = sbr.rel (!%p19_p9) target bundleno = 3 (0x3), region = 110 }
 0x3b4   :  { %1308 = vsyncpa [#allocation3], 1 }
 0x3b5   :  { %1310 = vsyncpa [#allocation3 + $0x1], 1 }

</bundles_post_ra>
